<compile_context>
chip_gen: v5e
topology: v5e:2x2
jax: 0.10.0
libtpu: 0.0.40
codegen_flags: <defaults>
</compile_context>

<pallas_src>
import functools

import jax
import jax.numpy as jnp
from jax import lax
from jax.experimental import pallas as pl
from jax.experimental.pallas import tpu as pltpu


# ---------------------------------------------------------------------------
# Kernel 1: soft (KL) distillation loss + student cross-entropy ("train") loss.
# Tiny [B, C] problem -> single invocation, scalar results written to SMEM.
# ---------------------------------------------------------------------------
def _losses_kernel(t_logits_ref, s_logits_ref, labels_ref, soft_ref, train_ref,
                   *, temperature):
    t = t_logits_ref[...].astype(jnp.float32)          # [B, C]
    s = s_logits_ref[...].astype(jnp.float32)          # [B, C]
    B, C = t.shape
    inv_t = 1.0 / temperature

    # Shared row maxes: max(x/T) == max(x)/T, so one max pass per tensor serves
    # both the temperature-scaled softmaxes and the T=1 student log-softmax.
    t_max = jnp.max(t, axis=-1, keepdims=True)
    s_max = jnp.max(s, axis=-1, keepdims=True)

    tc = (t - t_max) * inv_t
    sc = (s - s_max) * inv_t
    log_p = tc - jnp.log(jnp.sum(jnp.exp(tc), axis=-1, keepdims=True))   # teacher
    log_q = sc - jnp.log(jnp.sum(jnp.exp(sc), axis=-1, keepdims=True))   # student
    p = jnp.exp(log_p)

    # F.kl_div(log_q, p, reduction='batchmean') * T * T
    soft_ref[0, 0] = (jnp.sum(p * (log_p - log_q)) / B) * (temperature * temperature)

    # student cross-entropy loss (what s_model returns when labels are given)
    s1 = s - s_max
    log_q1 = s1 - jnp.log(jnp.sum(jnp.exp(s1), axis=-1, keepdims=True))
    onehot = (lax.broadcasted_iota(jnp.int32, (B, C), 1)
              == labels_ref[...]).astype(jnp.float32)                    # [B, C]
    train_ref[0, 0] = -jnp.sum(onehot * log_q1) / B


def _losses(t_logits, s_logits, labels, temperature):
    B, _ = t_logits.shape
    labels2d = labels.reshape(B, 1).astype(jnp.int32)
    kern = functools.partial(_losses_kernel, temperature=float(temperature))
    soft, train = pl.pallas_call(
        kern,
        out_shape=(jax.ShapeDtypeStruct((1, 1), jnp.float32),
                   jax.ShapeDtypeStruct((1, 1), jnp.float32)),
        in_specs=[pl.BlockSpec(memory_space=pltpu.MemorySpace.VMEM),
                  pl.BlockSpec(memory_space=pltpu.MemorySpace.VMEM),
                  pl.BlockSpec(memory_space=pltpu.MemorySpace.VMEM)],
        out_specs=(pl.BlockSpec(memory_space=pltpu.MemorySpace.SMEM),
                   pl.BlockSpec(memory_space=pltpu.MemorySpace.SMEM)),
    )(t_logits, s_logits, labels2d)
    return soft[0, 0], train[0, 0]


# ---------------------------------------------------------------------------
# Kernel 2: pairwise squared distances between student and teacher features.
#   dist[i, j] = ||s_i||^2 + ||t_j||^2 - 2 s_i . t_j
# The Gram matrix AND both row-norm vectors are accumulated per D-chunk from the
# same VMEM tiles (one HBM read of each slab); the clamp/combine happens at the
# last reduction step on the resident f32 output block.
# ---------------------------------------------------------------------------
def _pdist_kernel(s_ref, t_ref, o_ref, s2_ref, t2_ref):
    kk = pl.program_id(1)

    @pl.when(kk == 0)
    def _():
        o_ref[...] = jnp.zeros_like(o_ref)
        s2_ref[...] = jnp.zeros_like(s2_ref)
        t2_ref[...] = jnp.zeros_like(t2_ref)

    s = s_ref[...]                                      # (tb, dk), native dtype
    t = t_ref[...]                                      # (B,  dk), native dtype

    # Gram accumulation: MXU matmul with f32 accumulation into the resident block.
    o_ref[...] += lax.dot_general(
        s, t, (((1,), (1,)), ((), ())), preferred_element_type=jnp.float32)

    # In-kernel row-norm accumulation (data already in VMEM -> no extra HBM pass).
    s32 = s.astype(jnp.float32)
    t32 = t.astype(jnp.float32)
    s2_ref[...] += jnp.sum(s32 * s32, axis=1, keepdims=True)             # (tb, 1)
    # Teacher norm kept in lane orientation (1, B) via a rank-1 MXU product so no
    # sublane->lane transpose is needed when folding it in at the last step.
    ones_row = jnp.ones((1, t.shape[1]), jnp.float32)
    t2_ref[...] += lax.dot_general(
        ones_row, t32 * t32, (((1,), (1,)), ((), ())),
        preferred_element_type=jnp.float32)                              # (1, B)

    @pl.when(kk == pl.num_programs(1) - 1)
    def _():
        o_ref[...] = jnp.maximum(
            s2_ref[...] + t2_ref[...] - 2.0 * o_ref[...], 0.0)


def _vmem_capacity_bytes():
    try:
        info = pltpu.get_tpu_info()
        cap = getattr(info, "vmem_capacity_bytes", None)
        if cap:
            return int(cap)
    except Exception:
        pass
    return 64 * 1024 * 1024          # conservative default (v7x per-core VMEM)


def _is_megacore(vmem_cap):
    # v7x: 64 MiB VMEM per TensorCore, 2 TensorCores/chip.  v5e/v6e: 128 MiB, 1 TC.
    if vmem_cap < (128 << 20):
        return True
    try:
        kind = jax.devices()[0].device_kind.lower()
    except Exception:
        kind = ""
    return ("v4" in kind) or ("v5p" in kind)     # v4/v5p are also 2-core megacore


def _choose_tiles(B, D, itemsize, live_budget, megacore):
    """Pick (row_tile tb, d_block, pad) so the real live set
       2*tb*dk + 2*B*dk (double-buffered inputs) + 2*tb*B*4 (resident f32 output)
       + norm scratch stays under `live_budget`."""
    # Row-tile candidates: B//2 on megacore chips (engage both TensorCores);
    # full B on single-core chips (no teacher re-reads); halve further only if
    # the budget forces it.
    if megacore and B >= 16 and B % 16 == 0:
        row_cands = [B // 2]
    else:
        row_cands = [B]
    t = row_cands[-1]
    while t % 16 == 0 and t // 2 >= 8:
        t //= 2
        row_cands.append(t)

    for tb in row_cands:
        fixed = 2 * tb * B * 4 + (tb + B + 8) * 4
        avail = live_budget - fixed
        if avail <= 0:
            continue
        dmax = avail // (2 * (tb + B) * itemsize)
        if D <= dmax:
            return tb, D, 0                          # single-step fast path
        if dmax < 128:
            continue
        # prefer a multiple-of-128 divisor of D (avoids the zero-pad HBM copy)
        best_div, d = 0, 128
        while d <= dmax:
            if D % d == 0:
                best_div = d
            d += 128
        if best_div >= max(128, dmax // 2):
            return tb, best_div, 0
        d_block = (int(dmax) // 128) * 128           # zero-pad D to a multiple
        return tb, d_block, (-D) % d_block

    tb = row_cands[-1]                               # last resort
    if D <= 128:
        return tb, D, 0
    return tb, 128, (-D) % 128


def _pairwise_sq_dist(s_flat, t_flat):
    B, D = s_flat.shape
    itemsize = s_flat.dtype.itemsize

    vmem_cap = _vmem_capacity_bytes()
    megacore = _is_megacore(vmem_cap)
    if vmem_cap >= (128 << 20):          # v5e / v6e: exploit the 128 MiB VMEM
        live_budget, vmem_limit = 80 << 20, 100 << 20
    else:                                # v7x: 64 MiB physical per TensorCore
        live_budget, vmem_limit = 26 << 20, 32 << 20

    tb, d_block, pad = _choose_tiles(B, D, itemsize, live_budget, megacore)
    if pad:
        # zeros change neither the Gram matrix nor the accumulated norms
        s_flat = jnp.pad(s_flat, ((0, 0), (0, pad)))
        t_flat = jnp.pad(t_flat, ((0, 0), (0, pad)))
    Dp = D + pad

    return pl.pallas_call(
        _pdist_kernel,
        out_shape=jax.ShapeDtypeStruct((B, B), jnp.float32),
        grid=(B // tb, Dp // d_block),
        in_specs=[
            pl.BlockSpec((tb, d_block), lambda i, kk: (i, kk)),   # student rows
            pl.BlockSpec((B, d_block), lambda i, kk: (0, kk)),    # all teacher rows
        ],
        out_specs=pl.BlockSpec((tb, B), lambda i, kk: (i, 0)),
        scratch_shapes=[pltpu.VMEM((tb, 1), jnp.float32),         # ||s||^2 accum
                        pltpu.VMEM((1, B), jnp.float32)],         # ||t||^2 accum
        compiler_params=pltpu.CompilerParams(
            dimension_semantics=("parallel", "arbitrary"),
            vmem_limit_bytes=vmem_limit),
    )(s_flat, t_flat)


# ---------------------------------------------------------------------------
# Full forward (given model outputs)
# ---------------------------------------------------------------------------
def patient_distillation(t_logits, s_logits, t_features, s_features, labels,
                         k, temperature):
    B = s_features.shape[0]
    D = 1
    for d in s_features.shape[1:]:
        D *= int(d)
    s_flat = s_features.reshape(B, D)
    t_flat = t_features.reshape(B, D)

    soft_loss, train_loss = _losses(t_logits, s_logits, labels, temperature)
    dist = _pairwise_sq_dist(s_flat, t_flat)                      # [B, B] f32

    # --- k-NN (same label) epilogue --------------------------------------
    same = labels[:, None] == labels[None, :]                     # same-label mask
    counts = jnp.sum(same, axis=1).astype(jnp.int32)              # per-sample count
    # PyTorch mutates `k` inside its loop -> effective k at sample i is the
    # running minimum over the initial k and counts[0..i] (inclusive).
    k_eff = jnp.minimum(jnp.int32(k), lax.cummin(counts, axis=0))

    # k is small -> partial top-k of the negated masked distances instead of a
    # full O(B^2 log B) sort (perf-review item).
    k_cap = int(min(int(k), B))
    masked = jnp.where(same, dist, jnp.inf)
    smallest = -lax.top_k(-masked, k_cap)[0]                      # [B, k_cap] ascending
    csum = jnp.cumsum(smallest, axis=1)
    idx = (jnp.clip(k_eff, 1, k_cap) - 1)[:, None]
    per_sample = jnp.take_along_axis(csum, idx, axis=1)[:, 0]
    # mse_loss(...).mean(dim=(1,2)).sum() == (sum of k smallest sq-dists) / (S*H)
    distill_loss = jnp.sum(per_sample) / D

    return train_loss, soft_loss, distill_loss


if __name__ == "__main__":
    key = jax.random.PRNGKey(0)
    B, S, H, C = 8, 8, 32, 4     # batch, seq, hidden, num classes
    k = 3
    temperature = 2.0

    k1, k2, k3, k4, k5 = jax.random.split(key, 5)
    t_logits = jax.random.normal(k1, (B, C), jnp.float32)
    s_logits = jax.random.normal(k2, (B, C), jnp.float32)
    # f32 last-hidden-states (matches the PyTorch reference numerics); the
    # kernels also accept bf16 feeds for half the HBM traffic if desired.
    t_features = jax.random.normal(k3, (B, S, H), jnp.float32)
    s_features = jax.random.normal(k4, (B, S, H), jnp.float32)
    labels = jax.random.randint(k5, (B,), 0, C, jnp.int32)

    fn = jax.jit(functools.partial(patient_distillation, k=k,
                                   temperature=temperature))
    train_loss, soft_loss, distill_loss = fn(t_logits, s_logits,
                                             t_features, s_features, labels)
    jax.block_until_ready((train_loss, soft_loss, distill_loss))
    print("KERNEL_OK")
</pallas_src>

<mosaic_0001>
module attributes {stable_mosaic.version = 11 : i64} {
  func.func @_pdist_kernel(%arg0: i32, %arg1: i32, %arg2: memref<8x256xf32, #tpu.memory_space<vmem>>, %arg3: memref<8x256xf32, #tpu.memory_space<vmem>>, %arg4: memref<8x8xf32, #tpu.memory_space<vmem>>, %arg5: memref<8x1xf32, #tpu.memory_space<vmem>>, %arg6: memref<1x8xf32, #tpu.memory_space<vmem>>) attributes {dimension_semantics = [#tpu.dimension_semantics<parallel>, #tpu.dimension_semantics<arbitrary>], iteration_bounds = array<i64: 1, 1>, scalar_prefetch = 0 : i64, scratch_operands = 2 : i64, tpu.core_type = #tpu.core_type<tc>, window_params = [{transform_indices = @transform_0, window_bounds = array<i64: 8, 256>}, {transform_indices = @transform_1, window_bounds = array<i64: 8, 256>}, {transform_indices = @transform_2, window_bounds = array<i64: 8, 8>}]} {
    %c0_i32 = arith.constant 0 : i32
    %0 = arith.cmpi eq, %arg1, %c0_i32 : i32
    %1 = arith.extui %0 : i1 to i32
    %c0_i32_0 = arith.constant 0 : i32
    %2 = arith.cmpi ne, %1, %c0_i32_0 : i32
    scf.if %2 {
      %cst_21 = arith.constant 0.000000e+00 : f32
      %24 = vector.broadcast %cst_21 : f32 to vector<8x8xf32>
      %c0_22 = arith.constant 0 : index
      %c0_23 = arith.constant 0 : index
      %25 = vector.load %arg4[%c0_22, %c0_23] : memref<8x8xf32, #tpu.memory_space<vmem>>, vector<8x8xf32>
      tpu.vector_store %arg4[%c0_22, %c0_23], %24 {strides = array<i32>} : memref<8x8xf32, #tpu.memory_space<vmem>>, vector<8x8xf32>,
      %cst_24 = arith.constant 0.000000e+00 : f32
      %26 = vector.broadcast %cst_24 : f32 to vector<8x1xf32>
      %c0_25 = arith.constant 0 : index
      %c0_26 = arith.constant 0 : index
      %27 = vector.load %arg5[%c0_25, %c0_26] : memref<8x1xf32, #tpu.memory_space<vmem>>, vector<8x1xf32>
      tpu.vector_store %arg5[%c0_25, %c0_26], %26 {strides = array<i32>} : memref<8x1xf32, #tpu.memory_space<vmem>>, vector<8x1xf32>,
      %cst_27 = arith.constant 0.000000e+00 : f32
      %28 = vector.broadcast %cst_27 : f32 to vector<1x8xf32>
      %c0_28 = arith.constant 0 : index
      %c0_29 = arith.constant 0 : index
      %29 = vector.load %arg6[%c0_28, %c0_29] : memref<1x8xf32, #tpu.memory_space<vmem>>, vector<1x8xf32>
      tpu.vector_store %arg6[%c0_28, %c0_29], %28 {strides = array<i32>} : memref<1x8xf32, #tpu.memory_space<vmem>>, vector<1x8xf32>,
    } else {
    }
    %c0 = arith.constant 0 : index
    %c0_1 = arith.constant 0 : index
    %3 = vector.load %arg2[%c0, %c0_1] : memref<8x256xf32, #tpu.memory_space<vmem>>, vector<8x256xf32>
    %c0_2 = arith.constant 0 : index
    %c0_3 = arith.constant 0 : index
    %4 = vector.load %arg3[%c0_2, %c0_3] : memref<8x256xf32, #tpu.memory_space<vmem>>, vector<8x256xf32>
    %c0_4 = arith.constant 0 : index
    %c0_5 = arith.constant 0 : index
    %5 = vector.load %arg4[%c0_4, %c0_5] : memref<8x8xf32, #tpu.memory_space<vmem>>, vector<8x8xf32>
    %cst = arith.constant dense<0.000000e+00> : vector<8x8xf32>
    %6 = tpu.matmul %3, %4, %cst {dimension_numbers = #tpu.dot_dimension_numbers<[1], [1], [0], [0], [0, 0, 1, 0], [], []>} : vector<8x256xf32>, vector<8x256xf32>, vector<8x8xf32> -> vector<8x8xf32>
    %7 = arith.addf %5, %6 : vector<8x8xf32>
    %c0_6 = arith.constant 0 : index
    %c0_7 = arith.constant 0 : index
    %8 = vector.load %arg4[%c0_6, %c0_7] : memref<8x8xf32, #tpu.memory_space<vmem>>, vector<8x8xf32>
    tpu.vector_store %arg4[%c0_6, %c0_7], %7 {strides = array<i32>} : memref<8x8xf32, #tpu.memory_space<vmem>>, vector<8x8xf32>,
    %c0_8 = arith.constant 0 : index
    %c0_9 = arith.constant 0 : index
    %9 = vector.load %arg5[%c0_8, %c0_9] : memref<8x1xf32, #tpu.memory_space<vmem>>, vector<8x1xf32>
    %10 = arith.mulf %3, %3 : vector<8x256xf32>
    %cst_10 = arith.constant dense<0.000000e+00> : vector<8xf32>
    %11 = vector.multi_reduction <add>, %10, %cst_10 [1] : vector<8x256xf32> to vector<8xf32>
    %12 = vector.shape_cast %11 : vector<8xf32> to vector<8x1xf32>
    %13 = arith.addf %9, %12 : vector<8x1xf32>
    %c0_11 = arith.constant 0 : index
    %c0_12 = arith.constant 0 : index
    %14 = vector.load %arg5[%c0_11, %c0_12] : memref<8x1xf32, #tpu.memory_space<vmem>>, vector<8x1xf32>
    tpu.vector_store %arg5[%c0_11, %c0_12], %13 {strides = array<i32>} : memref<8x1xf32, #tpu.memory_space<vmem>>, vector<8x1xf32>,
    %cst_13 = arith.constant 1.000000e+00 : f32
    %15 = vector.broadcast %cst_13 : f32 to vector<1x256xf32>
    %c0_14 = arith.constant 0 : index
    %c0_15 = arith.constant 0 : index
    %16 = vector.load %arg6[%c0_14, %c0_15] : memref<1x8xf32, #tpu.memory_space<vmem>>, vector<1x8xf32>
    %17 = arith.mulf %4, %4 : vector<8x256xf32>
    %cst_16 = arith.constant dense<0.000000e+00> : vector<1x8xf32>
    %18 = tpu.matmul %15, %17, %cst_16 {dimension_numbers = #tpu.dot_dimension_numbers<[1], [1], [0], [0], [0, 0, 1, 0], [], []>} : vector<1x256xf32>, vector<8x256xf32>, vector<1x8xf32> -> vector<1x8xf32>
    %19 = arith.addf %16, %18 : vector<1x8xf32>
    %c0_17 = arith.constant 0 : index
    %c0_18 = arith.constant 0 : index
    %20 = vector.load %arg6[%c0_17, %c0_18] : memref<1x8xf32, #tpu.memory_space<vmem>>, vector<1x8xf32>
    tpu.vector_store %arg6[%c0_17, %c0_18], %19 {strides = array<i32>} : memref<1x8xf32, #tpu.memory_space<vmem>>, vector<1x8xf32>,
    %c0_i32_19 = arith.constant 0 : i32
    %21 = arith.cmpi eq, %arg1, %c0_i32_19 : i32
    %22 = arith.extui %21 : i1 to i32
    %c0_i32_20 = arith.constant 0 : i32
    %23 = arith.cmpi ne, %22, %c0_i32_20 : i32
    scf.if %23 {
      %c0_21 = arith.constant 0 : index
      %c0_22 = arith.constant 0 : index
      %24 = vector.load %arg5[%c0_21, %c0_22] : memref<8x1xf32, #tpu.memory_space<vmem>>, vector<8x1xf32>
      %c0_23 = arith.constant 0 : index
      %c0_24 = arith.constant 0 : index
      %25 = vector.load %arg6[%c0_23, %c0_24] : memref<1x8xf32, #tpu.memory_space<vmem>>, vector<1x8xf32>
      %26 = vector.broadcast %24 : vector<8x1xf32> to vector<8x8xf32>
      %27 = vector.broadcast %25 : vector<1x8xf32> to vector<8x8xf32>
      %28 = arith.addf %26, %27 : vector<8x8xf32>
      %c0_25 = arith.constant 0 : index
      %c0_26 = arith.constant 0 : index
      %29 = vector.load %arg4[%c0_25, %c0_26] : memref<8x8xf32, #tpu.memory_space<vmem>>, vector<8x8xf32>
      %cst_27 = arith.constant 2.000000e+00 : f32
      %30 = vector.broadcast %cst_27 : f32 to vector<8x8xf32>
      %31 = arith.mulf %30, %29 : vector<8x8xf32>
      %32 = arith.subf %28, %31 : vector<8x8xf32>
      %cst_28 = arith.constant 0.000000e+00 : f32
      %33 = vector.broadcast %cst_28 : f32 to vector<8x8xf32>
      %34 = arith.maximumf %32, %33 : vector<8x8xf32>
      %c0_29 = arith.constant 0 : index
      %c0_30 = arith.constant 0 : index
      %35 = vector.load %arg4[%c0_29, %c0_30] : memref<8x8xf32, #tpu.memory_space<vmem>>, vector<8x8xf32>
      tpu.vector_store %arg4[%c0_29, %c0_30], %34 {strides = array<i32>} : memref<8x8xf32, #tpu.memory_space<vmem>>, vector<8x8xf32>,
    } else {
    }
    return
  }
  func.func @transform_0(%arg0: i32, %arg1: i32) -> (i32, i32) {
    %c0_i32 = arith.constant 0 : i32
    return %arg0, %arg1 : i32, i32
  }
  func.func @transform_1(%arg0: i32, %arg1: i32) -> (i32, i32) {
    %c0_i32 = arith.constant 0 : i32
    %c0_i32_0 = arith.constant 0 : i32
    return %c0_i32, %arg1 : i32, i32
  }
  func.func @transform_2(%arg0: i32, %arg1: i32) -> (i32, i32) {
    %c0_i32 = arith.constant 0 : i32
    %c0_i32_0 = arith.constant 0 : i32
    return %arg0, %c0_i32 : i32, i32
  }
}

module attributes {stable_mosaic.version = 11 : i64} {
  func.func @_losses_kernel(%arg0: memref<8x4xf32, #tpu.memory_space<vmem>>, %arg1: memref<8x4xf32, #tpu.memory_space<vmem>>, %arg2: memref<8x1xi32, #tpu.memory_space<vmem>>, %arg3: memref<1x1xf32, #tpu.memory_space<smem>>, %arg4: memref<1x1xf32, #tpu.memory_space<smem>>) attributes {dimension_semantics = [], scalar_prefetch = 0 : i64, scratch_operands = 0 : i64, tpu.core_type = #tpu.core_type<tc>} {
    %c0 = arith.constant 0 : index
    %c0_0 = arith.constant 0 : index
    %0 = vector.load %arg0[%c0, %c0_0] : memref<8x4xf32, #tpu.memory_space<vmem>>, vector<8x4xf32>
    %c0_1 = arith.constant 0 : index
    %c0_2 = arith.constant 0 : index
    %1 = vector.load %arg1[%c0_1, %c0_2] : memref<8x4xf32, #tpu.memory_space<vmem>>, vector<8x4xf32>
    %cst = arith.constant dense<0xFF800000> : vector<8xf32>
    %2 = vector.multi_reduction <maximumf>, %0, %cst [1] : vector<8x4xf32> to vector<8xf32>
    %3 = vector.shape_cast %2 : vector<8xf32> to vector<8x1xf32>
    %cst_3 = arith.constant dense<0xFF800000> : vector<8xf32>
    %4 = vector.multi_reduction <maximumf>, %1, %cst_3 [1] : vector<8x4xf32> to vector<8xf32>
    %5 = vector.shape_cast %4 : vector<8xf32> to vector<8x1xf32>
    %6 = vector.broadcast %3 : vector<8x1xf32> to vector<8x4xf32>
    %7 = arith.subf %0, %6 : vector<8x4xf32>
    %cst_4 = arith.constant 5.000000e-01 : f32
    %8 = vector.broadcast %cst_4 : f32 to vector<8x4xf32>
    %9 = arith.mulf %7, %8 : vector<8x4xf32>
    %10 = vector.broadcast %5 : vector<8x1xf32> to vector<8x4xf32>
    %11 = arith.subf %1, %10 : vector<8x4xf32>
    %cst_5 = arith.constant 5.000000e-01 : f32
    %12 = vector.broadcast %cst_5 : f32 to vector<8x4xf32>
    %13 = arith.mulf %11, %12 : vector<8x4xf32>
    %14 = math.exp %9 : vector<8x4xf32>
    %cst_6 = arith.constant dense<0.000000e+00> : vector<8xf32>
    %15 = vector.multi_reduction <add>, %14, %cst_6 [1] : vector<8x4xf32> to vector<8xf32>
    %16 = vector.shape_cast %15 : vector<8xf32> to vector<8x1xf32>
    %17 = math.log %16 : vector<8x1xf32>
    %18 = vector.broadcast %17 : vector<8x1xf32> to vector<8x4xf32>
    %19 = arith.subf %9, %18 : vector<8x4xf32>
    %20 = math.exp %13 : vector<8x4xf32>
    %cst_7 = arith.constant dense<0.000000e+00> : vector<8xf32>
    %21 = vector.multi_reduction <add>, %20, %cst_7 [1] : vector<8x4xf32> to vector<8xf32>
    %22 = vector.shape_cast %21 : vector<8xf32> to vector<8x1xf32>
    %23 = math.log %22 : vector<8x1xf32>
    %24 = vector.broadcast %23 : vector<8x1xf32> to vector<8x4xf32>
    %25 = arith.subf %13, %24 : vector<8x4xf32>
    %26 = math.exp %19 : vector<8x4xf32>
    %27 = arith.subf %19, %25 : vector<8x4xf32>
    %28 = arith.mulf %26, %27 : vector<8x4xf32>
    %29 = vector.shape_cast %28 : vector<8x4xf32> to vector<1x8x4xf32>
    %cst_8 = arith.constant dense<0.000000e+00> : vector<1xf32>
    %30 = vector.multi_reduction <add>, %29, %cst_8 [1, 2] : vector<1x8x4xf32> to vector<1xf32>
    %31 = vector.shape_cast %30 : vector<1xf32> to vector<1x1x1xf32>
    %32 = vector.extract %31[0, 0, 0] : f32 from vector<1x1x1xf32>
    %cst_9 = arith.constant 8.000000e+00 : f32
    %33 = arith.divf %32, %cst_9 : f32
    %cst_10 = arith.constant 4.000000e+00 : f32
    %34 = arith.mulf %33, %cst_10 : f32
    %c0_11 = arith.constant 0 : index
    %c0_12 = arith.constant 0 : index
    %35 = memref.load %arg3[%c0_11, %c0_12] : memref<1x1xf32, #tpu.memory_space<smem>>
    memref.store %34, %arg3[%c0_11, %c0_12] : memref<1x1xf32, #tpu.memory_space<smem>>
    %36 = vector.broadcast %5 : vector<8x1xf32> to vector<8x4xf32>
    %37 = arith.subf %1, %36 : vector<8x4xf32>
    %38 = math.exp %37 : vector<8x4xf32>
    %cst_13 = arith.constant dense<0.000000e+00> : vector<8xf32>
    %39 = vector.multi_reduction <add>, %38, %cst_13 [1] : vector<8x4xf32> to vector<8xf32>
    %40 = vector.shape_cast %39 : vector<8xf32> to vector<8x1xf32>
    %41 = math.log %40 : vector<8x1xf32>
    %42 = vector.broadcast %41 : vector<8x1xf32> to vector<8x4xf32>
    %43 = arith.subf %37, %42 : vector<8x4xf32>
    %44 = tpu.iota {dimensions = array<i32: 1>} : vector<8x4xi32>
    %c0_14 = arith.constant 0 : index
    %c0_15 = arith.constant 0 : index
    %45 = vector.load %arg2[%c0_14, %c0_15] : memref<8x1xi32, #tpu.memory_space<vmem>>, vector<8x1xi32>
    %46 = vector.broadcast %45 : vector<8x1xi32> to vector<8x4xi32>
    %47 = arith.cmpi eq, %44, %46 : vector<8x4xi32>
    %48 = arith.extui %47 : vector<8x4xi1> to vector<8x4xi32>
    %49 = arith.sitofp %48 : vector<8x4xi32> to vector<8x4xf32>
    %50 = arith.mulf %49, %43 : vector<8x4xf32>
    %51 = vector.shape_cast %50 : vector<8x4xf32> to vector<1x8x4xf32>
    %cst_16 = arith.constant dense<0.000000e+00> : vector<1xf32>
    %52 = vector.multi_reduction <add>, %51, %cst_16 [1, 2] : vector<1x8x4xf32> to vector<1xf32>
    %53 = vector.shape_cast %52 : vector<1xf32> to vector<1x1x1xf32>
    %54 = vector.extract %53[0, 0, 0] : f32 from vector<1x1x1xf32>
    %cst_17 = arith.constant 0.000000e+00 : f32
    %55 = arith.subf %cst_17, %54 : f32
    %cst_18 = arith.constant 8.000000e+00 : f32
    %56 = arith.divf %55, %cst_18 : f32
    %c0_19 = arith.constant 0 : index
    %c0_20 = arith.constant 0 : index
    %57 = memref.load %arg4[%c0_19, %c0_20] : memref<1x1xf32, #tpu.memory_space<smem>>
    memref.store %56, %arg4[%c0_19, %c0_20] : memref<1x1xf32, #tpu.memory_space<smem>>
    return
  }
}

</mosaic_0001>

<bundles_post_ra>
// kernel: patient_distillation.2
= control target key start
LH: loop header
LB: loop body
LE: loop exit
PB: predicated region body
PF: predicated region fallthrough
CT: control target
= control target key end

     0   :  { %10 = vsyncpa [#allocation3], 0  ;;  %vm20_vm0 = vcmask 31744   ;;  %s252_s0 = inlined_call_operand.vmem [shape: f32[8,4], index: 0, kind: input, shape index: {}]   ;;  %s253_s1 = inlined_call_operand.vmem [shape: f32[8,4], index: 1, kind: input, shape index: {}]   ;;  %s254_s2 = inlined_call_operand.vmem [shape: s32[8,1], index: 2, kind: input, shape index: {}]   ;;  %s255_s3 = inlined_call_operand.hbm [shape: f32[1,1], index: 3, kind: output, shape index: {0}]   ;;  %s256_s4 = inlined_call_operand.hbm [shape: f32[1,1], index: 4, kind: output, shape index: {1}]  }
   0x1   :  { %v18_v0 = vld [vmem:[%s252_s0] sm:$0xff] }
   0x2   :  { %11 = vsyncpa [#allocation5], 0  ;;  %v21_v1 = vsel %vm20_vm0, %v18_v0, -inf  ;;  %v19_v2 = vld [vmem:[%s253_s1] sm:$0xff]  ;;  %v200_v4 = vmov 0   ;;  %v81_v24 = vlaneseq  ;;  %v201_v36 = vmov 0.0  }
   0x3   :  { %22 = vmax.xlane.f32.xlu0 %v21_v1  ;;  %v24_v3 = vsel %vm20_vm0, %v19_v2, -inf  ;;  %154 = vset.pattern.permute.xlu2 %v200_v4  ;;  %v83_v20 = vld [vmem:[%s254_s2] sm:$0xff]  ;;  %v202_v45 = vmov 8.0   ;;  %s118_s21 = sshll.u32 %s255_s3, 4  ;;  %s127_s25 = sshll.u32 %s256_s4, 4  ;;  %s119_s21 = int_to_ptr.hbm [resolvable:$true] %s118_s21  ;;  %s128_s25 = int_to_ptr.hbm [resolvable:$true] %s127_s25 }
   0x4   :  { %155 = vset.pattern.permute.xlu0 %v200_v4  ;;  %v82_v28 = vand.u32 127, %v81_v24  ;;  %s203_s5 = smov [#allocation2]   ;;  %s204_s6 = smov [#allocation4]  }
   0xb   :  { %25 = vmax.xlane.f32.xlu0 %v24_v3 }
  0x76   :  { %v23_v5 = vpop.xlane.xlu0 %22 }
  0x77   :  { %v27_v6 = vsub.f32 %v18_v0, %v23_v5 }
  0x79   :  { %v28_v7 = vmul.f32 0.5, %v27_v6 }
  0x7b   :  { %v31_v8 = vmul.f32 1.442695, %v28_v7 }
  0x7d   :  { %156 = vpow2.f32 %v31_v8 }
  0x7e   :  { %v26_v9 = vpop.xlane.xlu0 %25 }
  0x7f   :  { %v29_v10 = vsub.f32 %v19_v2, %v26_v9 }
  0x81   :  { %v30_v11 = vmul.f32 0.5, %v29_v10  ;;  %v73_v12 = vmul.f32 1.442695, %v29_v10 }
  0x83   :  { %v157_v13 = vpop.eup %156  ;;  %v39_v14 = vmul.f32 1.442695, %v30_v11  ;;  %158 = vpow2.f32 %v73_v12 }
  0x84   :  { %v33_v15 = vsel %vm20_vm0, %v157_v13, 0.0 }
  0x85   :  { %34 = vadd.xlane.f32.xlu1 %v33_v15  ;;  %160 = vpow2.f32 %v39_v14 }
  0x89   :  { %v159_v16 = vpop.eup %158 }
  0x8a   :  { %v75_v17 = vsel %vm20_vm0, %v159_v16, 0.0 }
  0x8b   :  { %v161_v18 = vpop.eup %160  ;;  %76 = vadd.xlane.f32.xlu2 %v75_v17 }
  0x8c   :  { %v41_v19 = vsel %vm20_vm0, %v161_v18, 0.0 }
  0x8d   :  { %42 = vadd.xlane.f32.xlu1 %v41_v19 }
  0xa3   :  { %85 = vperm.xlu2 %154, %v83_v20  }
  0xf8   :  { %v35_v21 = vpop.xlane.xlu1 %34 }
  0xf9   :  { %162 = vlog2.f32 %v35_v21 }
  0xfe   :  { %v77_v22 = vpop.xlane.xlu2 %76 }
  0xff   :  { %v163_v23 = vpop.eup %162  ;;  %164 = vlog2.f32 %v77_v22 }
 0x100   :  { %v37_v25 = vmul.f32 0.6931472, %v163_v23  ;;  %v43_v26 = vpop.xlane.xlu1 %42 }
 0x101   :  { %166 = vlog2.f32 %v43_v26 }
 0x102   :  { %v38_v27 = vsub.f32 %v28_v7, %v37_v25 }
 0x104   :  { %v47_v29 = vmul.f32 1.442695, %v38_v27 }
 0x105   :  { %v165_v30 = vpop.eup %164 }
 0x106   :  { %168 = vpow2.f32 %v47_v29  ;;  %v79_v31 = vmul.f32 0.6931472, %v165_v30  ;;  %v86_v32 = vpop.permute.xlu2 %85 }
 0x107   :  { %v167_v33 = vpop.eup %166  ;;  %vm87_vm1 = vcmp.eq.s32.totalorder %v82_v28, %v86_v32  ;;  %170 = vrcp.f32 %v202_v45 }
 0x108   :  { %v80_v34 = vsub.f32 %v29_v10, %v79_v31  ;;  %v45_v35 = vmul.f32 0.6931472, %v167_v33  ;;  %v142_v37 = vsel %vm87_vm1, 1.0, %v201_v36 }
 0x10a   :  { %v46_v38 = vsub.f32 %v30_v11, %v45_v35  ;;  %v90_v39 = vmul.f32 %v142_v37, %v80_v34 }
 0x10c   :  { %v169_v40 = vpop.eup %168  ;;  %v91_v41 = vsel %vm20_vm0, %v90_v39, 0.0  ;;  %v49_v42 = vsub.f32 %v38_v27, %v46_v38 }
 0x10d   :  { %92 = vadd.xlane.f32.xlu1 %v91_v41  ;;  %v171_v46 = vpop.eup %170 }
 0x10e   :  { %v50_v43 = vmul.f32 %v169_v40, %v49_v42  ;;  %v62_v47 = vmul.f32 8.0, %v171_v46  ;;  %vm66_vm2 = vweird.f32 %v171_v46 }
 0x110   :  { %v51_v44 = vsel %vm20_vm0, %v50_v43, 0.0  ;;  %v63_v51 = vsub.f32 1.0, %v62_v47 }
 0x111   :  { %52 = vadd.xlane.f32.xlu0 %v51_v44 }
 0x112   :  { %v64_v56 = vmul.f32 %v171_v46, %v63_v51 }
 0x114   :  { %v65_v60 = vadd.f32 %v171_v46, %v64_v56 }
 0x116   :  { %v67_v0 = vsel %vm66_vm2, %v171_v46, %v65_v60 }
 0x180   :  { %v93_v48 = vpop.xlane.xlu1 %92 }
 0x181   :  { %v94_v49 = vrot.slane %v93_v48, 4 }
 0x183   :  { %v95_v50 = vadd.f32 %v94_v49, %v93_v48 }
 0x184   :  { %v53_v52 = vpop.xlane.xlu0 %52 }
 0x185   :  { %v96_v53 = vrot.slane %v95_v50, 2  ;;  %v54_v54 = vrot.slane %v53_v52, 4 }
 0x187   :  { %v55_v55 = vadd.f32 %v54_v54, %v53_v52  ;;  %v97_v57 = vadd.f32 %v96_v53, %v95_v50 }
 0x189   :  { %v56_v58 = vrot.slane %v55_v55, 2  ;;  %v98_v62 = vrot.slane %v97_v57, 1 }
 0x18b   :  { %v57_v59 = vadd.f32 %v56_v58, %v55_v55  ;;  %v99_v1 = vadd.f32 %v98_v62, %v97_v57 }
 0x18d   :  { %v58_v61 = vrot.slane %v57_v59, 1 }
 0x18f   :  { %v59_v63 = vadd.f32 %v58_v61, %v57_v59 }
 0x191   :  { %143 = vpush %v59_v63 }
 0x192   :  { %145 = vpush %v67_v0 }
 0x193   :  { %147 = vpush %v99_v1 }
 0x1c2   :  { %s144_s2 = spop %143 }
 0x1c3   :  { %s146_s22 = spop %145 }
 0x1c4   :  { %s69_s26 = smul.f32 %s146_s22, %s144_s2  ;;  %s148_s27 = spop %147 }
 0x1c5   :  { %s101_s28 = ssub.f32 0.0, %s148_s27 }
 0x1c6   :  { %s70_s29 = smul.f32 4.0, %s69_s26 }
 0x1c7   :  { %s110_s30 = smul.f32 %s146_s22, %s101_s28 }
 0x1c8   :  { %72 = sst [smem:[#allocation2]] %s70_s29 }
 0x1c9   :  { %112 = sst [smem:[#allocation4]] %s110_s30 }
 0x1ca   :  { %121 = dma.smem_to_hbm %s203_s5, 16, %s119_s21, [#allocation3]  }
 0x1cb   :  { %130 = dma.smem_to_hbm %s204_s6, 16, %s128_s25, [#allocation5]  }
 0x1cc   :  { %196 = dma.done.wait [#allocation3], 16  }
 0x1cd   :  { %197 = vsyncadd [#allocation3], 4294967280 }
 0x1ce   :  { %198 = dma.done.wait [#allocation5], 16  }
 0x1cf   :  { %199 = vsyncadd [#allocation5], 4294967280 }
 0x1d0   :  { %139 = sfence }
 0x1d1   :  { %140 = vsyncpa [#allocation3], 1 }
 0x1d2   :  { %141 = vsyncpa [#allocation5], 1 }

// kernel: patient_distillation.3
= control target key start
LH: loop header
LB: loop body
LE: loop exit
PB: predicated region body
PF: predicated region fallthrough
CT: control target
= control target key end

     0   :  { %vm17_vm0 = vcmask 7168   ;;  %v152_v3 = vmov 0.0   ;;  %v153_v10 = vmov 1.0   ;;  %v154_v11 = vmov 0   ;;  %s204_s0 = inlined_call_operand.vmem [shape: f32[8,256], index: 0, kind: input, shape index: {}]   ;;  %s205_s1 = inlined_call_operand.vmem [shape: f32[8,256], index: 1, kind: input, shape index: {}]   ;;  %s206_s2 = inlined_call_operand.vmem [shape: f32[8,8], index: 2, kind: output, shape index: {}]  }
   0x1   :  { %v21_v0 = vld [vmem:[%s204_s0] sm:$0xff]  ;;  %v22_v1 = vld [vmem:[%s204_s0 + $0x8] sm:$0xff]  ;;  %18 = vst.msk [vmem:[#allocation2] sm:$0xff] %vm17_vm0, %v152_v3  ;;  %150 = vset.pattern.permute.xlu0 %v154_v11  ;;  %vm19_vm1 = vcmask 57344   ;;  %vm15_vm2 = vcmask 64512  }
   0x2   :  { %v23_v2 = vld [vmem:[%s205_s1] sm:$0xff]  ;;  %v70_v4 = vmul.f32 %v21_v0, %v21_v0  ;;  %v71_v5 = vmul.f32 %v22_v1, %v22_v1  ;;  %v24_v7 = vld [vmem:[%s205_s1 + $0x8] sm:$0xff]  ;;  %20 = vst.msk [vmem:[#allocation3] sm:$0x1] %vm19_vm1, %v152_v3 }
   0x3   :  { %v79_v6 = vmul.f32 %v23_v2, %v23_v2  ;;  %41 = vmatpush.xpose.msra.mxu0 %v23_v2  ;;  %v80_v8 = vmul.f32 %v24_v7, %v24_v7  ;;  %61 = vmatpush.xpose.msra.mxu1 %v24_v7  ;;  %16 = vst.msk [vmem:[%s206_s2] sm:$0xff] %vm15_vm2, %v152_v3 }
   0x4   :  { %v72_v9 = vadd.f32 %v71_v5, %v70_v4 }
   0x5   :  { %96 = vmatpush.xpose.msra.mxu2 %v79_v6  ;;  %116 = vmatpush.xpose.msra.mxu3 %v80_v8 }
   0x6   :  { %42 = vmatmul.f32.vlgmr.msra.gmra.mxu0 %v21_v0  ;;  %73 = vadd.xlane.f32.xlu0 %v72_v9 }
   0x7   :  { %62 = vmatmul.f32.vlgmr.msra.gmra.mxu1 %v22_v1 }
   0x8   :  { %97 = vmatmul.f32.vlgmr.msra.gmra.mxu2 %v153_v10  ;;  %117 = vmatmul.f32.vlgmr.msra.gmra.mxu3 %v153_v10  ;;  %v69_v12 = vld [vmem:[#allocation2] sm:$0xff] }
   0x9   :  { %v78_v22 = vld [vmem:[#allocation3] sm:$0x1] }
   0xa   :  { %v25_v17 = vld [vmem:[%s206_s2] sm:$0xff] }
  0x79   :  { %v74_v13 = vpop.xlane.xlu0 %73 }
  0x7a   :  { %v75_v14 = vadd.f32 %v74_v13, %v69_v12 }
  0x7c   :  { %77 = vst.msk [vmem:[#allocation2] sm:$0xff] %vm17_vm0, %v75_v14 }
  0x83   :  { %v43_v15 = vpop.f32.mrf.mxu0  ;;  %v127_v16 = vld [vmem:[#allocation2] sm:$0xff] }
  0x84   :  { %v63_v18 = vpop.f32.mrf.mxu1  ;;  %131 = vperm.xlu0 %150, %v127_v16  }
  0x85   :  { %v64_v19 = vadd.f32 %v63_v18, %v43_v15 }
  0x87   :  { %v66_v20 = vadd.f32 %v64_v19, %v25_v17 }
  0x89   :  { %68 = vst.msk [vmem:[%s206_s2] sm:$0xff] %vm15_vm2, %v66_v20 }
  0x8b   :  { %v98_v21 = vpop.f32.mrf.mxu2  ;;  %v118_v23 = vpop.f32.mrf.mxu3 }
  0x8c   :  { %v119_v24 = vadd.f32 %v118_v23, %v98_v21 }
  0x8e   :  { %v121_v25 = vadd.f32 %v119_v24, %v78_v22 }
  0x90   :  { %123 = vst.msk [vmem:[#allocation3] sm:$0x1] %vm19_vm1, %v121_v25  ;;  %v138_v26 = vld [vmem:[%s206_s2] sm:$0xff] }
  0x91   :  { %v139_v28 = vmul.f32 2.0, %v138_v26 }
  0x97   :  { %v151_v27 = vld [vmem:[#allocation3] ss:$0 sm:$0xff] }
  0xf6   :  { %v132_v29 = vpop.permute.xlu0 %131 }
  0xf7   :  { %v137_v30 = vadd.f32 %v151_v27, %v132_v29 }
  0xf9   :  { %v140_v31 = vsub.f32 %v137_v30, %v139_v28 }
  0xfb   :  { %v141_v32 = vmax.f32 %v140_v31, 0.0 }
  0xfd   :  { %142 = vst.msk [vmem:[%s206_s2] sm:$0xff] %vm15_vm2, %v141_v32 }

</bundles_post_ra>
